<compile_context>
chip_gen: v5e
topology: v5e:2x2
jax: 0.10.0
libtpu: 0.0.40
codegen_flags: <defaults>
</compile_context>

<pallas_src>
import functools

import jax
import jax.numpy as jnp
from jax import lax
from jax.experimental import pallas as pl
from jax.experimental.pallas import tpu as pltpu

EPS = 0.001
LANES = 512              # lane-dense width (multiple of 128)
TARGET_TILE_ROWS = 1024  # 1024 * 512 * 4 B = 2 MiB per input block
NUM_PARTIALS = 2         # leading "parallel" grid axis (megacore on v7x)


def _round_up(x, m):
    return ((x + m - 1) // m) * m


def _soft_bce_kernel(p_ref, y_ref, out_ref, *, n_elem, tile_rows, needs_mask):
    c = pl.program_id(0)          # partial-sum index (parallel axis)
    i = pl.program_id(1)          # tile index within this partial (arbitrary)
    nt = pl.num_programs(1)

    @pl.when(i == 0)
    def _():
        out_ref[...] = jnp.zeros_like(out_ref)

    # .astype is a no-op for f32 inputs; keeps bf16 callers working too.
    p = jnp.clip(p_ref[...].astype(jnp.float32), EPS, 1.0 - EPS)
    y = y_ref[...].astype(jnp.float32)
    loss = -(y * jnp.log(p)) - (1.0 - y) * jnp.log(1.0 - p)

    if needs_mask:
        # Zero the contribution of padded elements (global flat idx >= n_elem).
        row0 = (c * nt + i) * tile_rows
        rows = lax.broadcasted_iota(jnp.int32, loss.shape, 0) + row0
        cols = lax.broadcasted_iota(jnp.int32, loss.shape, 1)
        gidx = rows * LANES + cols
        loss = jnp.where(gidx < n_elem, loss, 0.0)

    # Fold sublane-tile groups with pure VPU adds (no XLU reduce in the hot
    # loop) and accumulate into the resident (1, 8, LANES) output block.
    partial = loss.reshape(tile_rows // 8, 8, LANES).sum(axis=0)
    out_ref[...] += partial[None]


def soft_bce_loss(p, soft_label):
    """Mean soft-BCE loss. p and soft_label must have the same shape."""
    assert p.shape == soft_label.shape
    n_elem = p.size
    assert n_elem > 0
    # In-kernel tail masking uses int32 flat indices.
    # TODO(synk): switch the mask index math to int64/row-tail form for >2^31 elements.
    assert n_elem < 2**31

    # Lane-dense 2D layout + tiling choices (all static Python ints).
    rows_needed = -(-n_elem // LANES)
    rows_per_part = -(-rows_needed // NUM_PARTIALS)
    tile_rows = min(TARGET_TILE_ROWS, _round_up(rows_per_part, 8))
    tiles_per_part = -(-rows_per_part // tile_rows)
    m_pad = NUM_PARTIALS * tiles_per_part * tile_rows
    padded = m_pad * LANES
    needs_mask = padded != n_elem

    p_flat = p.reshape(-1)
    y_flat = soft_label.reshape(-1)
    if needs_mask:
        # Pad p with 0.5 (safe under the clamp), labels with 0.0; padded
        # elements are masked out of the sum inside the kernel.
        p_flat = jnp.pad(p_flat, (0, padded - n_elem), constant_values=0.5)
        y_flat = jnp.pad(y_flat, (0, padded - n_elem), constant_values=0.0)
    p2 = p_flat.reshape(m_pad, LANES)
    y2 = y_flat.reshape(m_pad, LANES)

    kernel = functools.partial(
        _soft_bce_kernel,
        n_elem=n_elem,
        tile_rows=tile_rows,
        needs_mask=needs_mask,
    )

    in_block = pl.BlockSpec(
        (tile_rows, LANES), lambda c, i: (c * tiles_per_part + i, 0)
    )

    partials = pl.pallas_call(
        kernel,
        out_shape=jax.ShapeDtypeStruct((NUM_PARTIALS, 8, LANES), jnp.float32),
        grid=(NUM_PARTIALS, tiles_per_part),
        in_specs=[in_block, in_block],
        out_specs=pl.BlockSpec((1, 8, LANES), lambda c, i: (c, 0, 0)),
        compiler_params=pltpu.CompilerParams(
            dimension_semantics=("parallel", "arbitrary"),
        ),
    )(p2, y2)

    # Single cheap cross-lane reduction + mean, done once in XLA.
    return (jnp.sum(partials) / jnp.float32(n_elem)).astype(jnp.float32)


if __name__ == "__main__":
    key = jax.random.PRNGKey(0)
    k1, k2 = jax.random.split(key)

    # Small shapes: 16 "rows" of 256 probabilities.
    shape = (16, 256)
    p = jax.nn.sigmoid(jax.random.normal(k1, shape, dtype=jnp.float32))
    soft_label = jax.random.uniform(k2, shape, dtype=jnp.float32)

    out = soft_bce_loss(p, soft_label)
    out = jax.block_until_ready(out)

    # Pure-JAX reference for a sanity check.
    pc = jnp.clip(p, EPS, 1.0 - EPS)
    ref = jnp.mean(
        -(soft_label * jnp.log(pc)) - (1.0 - soft_label) * jnp.log(1.0 - pc)
    )
    assert jnp.allclose(out, ref, rtol=1e-5, atol=1e-6), (out, ref)

    print("KERNEL_OK")
</pallas_src>

<mosaic_0001>
module attributes {stable_mosaic.version = 11 : i64} {
  func.func @_soft_bce_kernel(%arg0: i32, %arg1: i32, %arg2: memref<8x512xf32, #tpu.memory_space<vmem>>, %arg3: memref<8x512xf32, #tpu.memory_space<vmem>>, %arg4: memref<1x8x512xf32, #tpu.memory_space<vmem>>) attributes {dimension_semantics = [#tpu.dimension_semantics<parallel>, #tpu.dimension_semantics<arbitrary>], iteration_bounds = array<i64: 2, 1>, scalar_prefetch = 0 : i64, scratch_operands = 0 : i64, tpu.core_type = #tpu.core_type<tc>, window_params = [{transform_indices = @transform_0, window_bounds = array<i64: 8, 512>}, {transform_indices = @transform_1, window_bounds = array<i64: 8, 512>}, {transform_indices = @transform_2, window_bounds = array<i64: 1, 8, 512>}]} {
    %c0_i32 = arith.constant 0 : i32
    %0 = arith.cmpi eq, %arg1, %c0_i32 : i32
    %1 = arith.extui %0 : i1 to i32
    %c0_i32_0 = arith.constant 0 : i32
    %2 = arith.cmpi ne, %1, %c0_i32_0 : i32
    scf.if %2 {
      %cst_16 = arith.constant 0.000000e+00 : f32
      %40 = vector.broadcast %cst_16 : f32 to vector<1x8x512xf32>
      %c0_17 = arith.constant 0 : index
      %c0_18 = arith.constant 0 : index
      %c0_19 = arith.constant 0 : index
      %41 = vector.load %arg4[%c0_17, %c0_18, %c0_19] : memref<1x8x512xf32, #tpu.memory_space<vmem>>, vector<1x8x512xf32>
      tpu.vector_store %arg4[%c0_17, %c0_18, %c0_19], %40 {strides = array<i32>} : memref<1x8x512xf32, #tpu.memory_space<vmem>>, vector<1x8x512xf32>,
    } else {
    }
    %c0 = arith.constant 0 : index
    %c0_1 = arith.constant 0 : index
    %3 = vector.load %arg2[%c0, %c0_1] : memref<8x512xf32, #tpu.memory_space<vmem>>, vector<8x512xf32>
    %cst = arith.constant 1.000000e-03 : f32
    %cst_2 = arith.constant 9.990000e-01 : f32
    %4 = vector.broadcast %cst : f32 to vector<8x512xf32>
    %5 = arith.maximumf %4, %3 : vector<8x512xf32>
    %6 = vector.broadcast %cst_2 : f32 to vector<8x512xf32>
    %7 = arith.minimumf %6, %5 : vector<8x512xf32>
    %c0_3 = arith.constant 0 : index
    %c0_4 = arith.constant 0 : index
    %8 = vector.load %arg3[%c0_3, %c0_4] : memref<8x512xf32, #tpu.memory_space<vmem>>, vector<8x512xf32>
    %9 = math.log %7 : vector<8x512xf32>
    %10 = arith.mulf %8, %9 : vector<8x512xf32>
    %cst_5 = arith.constant 0.000000e+00 : f32
    %11 = vector.broadcast %cst_5 : f32 to vector<8x512xf32>
    %12 = arith.subf %11, %10 : vector<8x512xf32>
    %cst_6 = arith.constant 1.000000e+00 : f32
    %13 = vector.broadcast %cst_6 : f32 to vector<8x512xf32>
    %14 = arith.subf %13, %8 : vector<8x512xf32>
    %cst_7 = arith.constant 1.000000e+00 : f32
    %15 = vector.broadcast %cst_7 : f32 to vector<8x512xf32>
    %16 = arith.subf %15, %7 : vector<8x512xf32>
    %17 = math.log %16 : vector<8x512xf32>
    %18 = arith.mulf %14, %17 : vector<8x512xf32>
    %19 = arith.subf %12, %18 : vector<8x512xf32>
    %c1_i32 = arith.constant 1 : i32
    %20 = arith.muli %arg0, %c1_i32 : i32
    %21 = arith.addi %20, %arg1 : i32
    %c8_i32 = arith.constant 8 : i32
    %22 = arith.muli %21, %c8_i32 : i32
    %23 = tpu.iota {dimensions = array<i32: 0>} : vector<8x512xi32>
    %24 = vector.broadcast %22 : i32 to vector<8x512xi32>
    %25 = arith.addi %23, %24 : vector<8x512xi32>
    %26 = tpu.iota {dimensions = array<i32: 1>} : vector<8x512xi32>
    %c512_i32 = arith.constant 512 : i32
    %27 = vector.broadcast %c512_i32 : i32 to vector<8x512xi32>
    %28 = arith.muli %25, %27 : vector<8x512xi32>
    %29 = arith.addi %28, %26 : vector<8x512xi32>
    %c4096_i32 = arith.constant 4096 : i32
    %30 = vector.broadcast %c4096_i32 : i32 to vector<8x512xi32>
    %31 = arith.cmpi slt, %29, %30 : vector<8x512xi32>
    %cst_8 = arith.constant 0.000000e+00 : f32
    %32 = vector.broadcast %cst_8 : f32 to vector<8x512xf32>
    %33 = arith.select %31, %19, %32 : vector<8x512xi1>, vector<8x512xf32>
    %34 = vector.shape_cast %33 : vector<8x512xf32> to vector<1x8x512xf32>
    %cst_9 = arith.constant dense<0.000000e+00> : vector<8x512xf32>
    %35 = vector.multi_reduction <add>, %34, %cst_9 [0] : vector<1x8x512xf32> to vector<8x512xf32>
    %c0_10 = arith.constant 0 : index
    %c0_11 = arith.constant 0 : index
    %c0_12 = arith.constant 0 : index
    %36 = vector.load %arg4[%c0_10, %c0_11, %c0_12] : memref<1x8x512xf32, #tpu.memory_space<vmem>>, vector<1x8x512xf32>
    %37 = vector.shape_cast %35 : vector<8x512xf32> to vector<1x8x512xf32>
    %38 = arith.addf %36, %37 : vector<1x8x512xf32>
    %c0_13 = arith.constant 0 : index
    %c0_14 = arith.constant 0 : index
    %c0_15 = arith.constant 0 : index
    %39 = vector.load %arg4[%c0_13, %c0_14, %c0_15] : memref<1x8x512xf32, #tpu.memory_space<vmem>>, vector<1x8x512xf32>
    tpu.vector_store %arg4[%c0_13, %c0_14, %c0_15], %38 {strides = array<i32>} : memref<1x8x512xf32, #tpu.memory_space<vmem>>, vector<1x8x512xf32>,
    return
  }
  func.func @transform_0(%arg0: i32, %arg1: i32) -> (i32, i32) {
    %c1_i32 = arith.constant 1 : i32
    %0 = arith.muli %arg0, %c1_i32 : i32
    %1 = arith.addi %0, %arg1 : i32
    %c0_i32 = arith.constant 0 : i32
    %c0_i32_0 = arith.constant 0 : i32
    return %1, %c0_i32 : i32, i32
  }
  func.func @transform_1(%arg0: i32, %arg1: i32) -> (i32, i32) {
    %c1_i32 = arith.constant 1 : i32
    %0 = arith.muli %arg0, %c1_i32 : i32
    %1 = arith.addi %0, %arg1 : i32
    %c0_i32 = arith.constant 0 : i32
    %c0_i32_0 = arith.constant 0 : i32
    return %1, %c0_i32 : i32, i32
  }
  func.func @transform_2(%arg0: i32, %arg1: i32) -> (i32, i32, i32) {
    %c0_i32 = arith.constant 0 : i32
    %c0_i32_0 = arith.constant 0 : i32
    %c0_i32_1 = arith.constant 0 : i32
    return %arg0, %c0_i32, %c0_i32_0 : i32, i32, i32
  }
}

</mosaic_0001>

<bundles_post_ra>
// kernel: tpu_custom_call.1
= control target key start
LH: loop header
LB: loop body
LE: loop exit
PB: predicated region body
PF: predicated region fallthrough
CT: control target
= control target key end

     0   :  { %7 = vsyncpa [#allocation3], 0  ;;  %s857_s0 = inlined_call_operand.hbm [shape: f32[16,512], index: 0, kind: input, shape index: {}]   ;;  %s858_s1 = inlined_call_operand.hbm [shape: f32[16,512], index: 1, kind: input, shape index: {}]   ;;  %s859_s2 = inlined_call_operand.hbm [shape: f32[2,8,512], index: 2, kind: output, shape index: {}]  }
   0x1   :  { %9 = vsyncpa [#allocation3 + $0x1], 0 }
   0x2   :  { %10 = vsyncpa [#allocation6], 0 }
   0x3   :  { %12 = vsyncpa [#allocation6 + $0x1], 0 }
   0x4   :  { %13 = vsyncpa [#allocation4], 0 }
   0x5   :  { %15 = vsyncpa [#allocation4 + $0x1], 0  ;;  %s716_s9 = smov 0   ;;  %s718_s10 = smov 0  }
   0x6   :  { %s720_s11 = smov 0   ;;  %s722_s12 = smov 0  }
   0x7   :  { %s724_s13 = smov 0   ;;  %s726_s14 = smov 0  }
   0x8 LB: > { %s446_s15 = sadd.s32 4294967295, %s699_s14   ;;  %s447_s16 = sadd.s32 4294967294, %s699_s14   ;;  %s699_s14 = sphi %s726_s14, %s21_s14   ;;  %s695_s13 = sphi %s724_s13, %s868_s13   ;;  %s691_s12 = sphi %s722_s12, %s867_s12   ;;  %s687_s11 = sphi %s720_s11, %s866_s11   ;;  %s683_s10 = sphi %s718_s10, %s865_s10   ;;  %s679_s9 = sphi %s716_s9, %s864_s9  }
   0x9   : > { %s33_s17 = sadd.s32 1, %s695_s13  ;;  %s42_s18 = sadd.s32 1, %s687_s11 }
   0xa   : > { %p35_p0 = scmp.ge.s32.totalorder %s33_s17, 2  ;;  %p49_p1 = scmp.ne.s32.totalorder %s687_s11, %s683_s10 }
   0xb   : > { %p50_p2 = scmp.eq.s32.totalorder %s699_s14, 0  ;;  %p55_p3 = scmp.ne.s32.totalorder %s683_s10, %s679_s9 }
   0xc   : > { %s870_s17 = smov (%p35_p0, %s33_s17), 0  ;;  %p56_p5 = scmp.eq.s32.totalorder %s446_s15, 0 }
   0xd   : > { %p757_p4 = por %p50_p2, %p49_p1  ;;  %s39_s20 = ssub.s32 %s695_s13, %s870_s17 }
   0xe   : > { %p107_p6 = scmp.eq.s32.totalorder %s446_s15, 1  ;;  %p40_p7 = scmp.eq.s32.totalorder %s39_s20, 0 }
   0xf   : > { %p763_p8 = por %p56_p5, %p55_p3  ;;  %p113_p10 = scmp.eq.s32.totalorder %s447_s16, 1 }
  0x10   : > { %p767_p9 = por %p107_p6, %p49_p1  ;;  %p449_p12 = scmp.ge.s32.totalorder %s699_s14, 2 }
  0x11   : > { %s772_s23 = scalar_select %p40_p7, %s687_s11, %s42_s18  }
  0x12   : > { %p774_p11 = por %p113_p10, %p55_p3  ;;  %p486_p13 = scmp.lt.s32.totalorder %s699_s14, 2 }
  0x13   : > { %s133_s25 = sand.u32 1, %s687_s11   ;;  %s466_s27 = sshll.u32 %s695_s13, 5 }
  0x14   : > { %s450_s26 = sshll.u32 %s133_s25, 5  ;;  %s143_s30 = scalar_lea.hbm %s857_s0, %s466_s27 }
  0x15   : > { %s137_s3 = scalar_lea.vmem [#allocation2], %s450_s26  ;;  %s145_s5 = sshll.u32 %s143_s30, 4  ;;  %s146_s5 = int_to_ptr.hbm [resolvable:$true] %s145_s5 }
  0x16   : > { %s147_s4 = sshll.u32 %s137_s3, 4  ;;  %p476_p0 = pnand %p486_p13, %p757_p4  ;;  %s148_s4 = int_to_ptr.vmem [resolvable:$true] %s147_s4 }
  0x17   : > { %p456_p1 = scmp.ge.s32.totalorder %s699_s14, 1  ;;  %p173_p2 = scmp.lt.s32.totalorder %s699_s14, 3 }
  0x18   : > { %s134_s6 = scalar_lea.sflag [#allocation3], %s133_s25  ;;  %s164_s15 = scalar_lea.hbm %s858_s1, %s466_s27 }
  0x19   : > { %478 = dma.hbm_to_vmem [thread:$0]  (!%p476_p0), %s146_s5, 512, %s148_s4, %s134_s6  }
  0x1a   : > { %p174_p3 = pnand %p456_p1, %p173_p2  ;;  %s158_s16 = scalar_lea.vmem [#allocation5], %s450_s26 }
  0x1b   : > { %s168_s18 = sshll.u32 %s158_s16, 4  ;;  %s166_s20 = sshll.u32 %s164_s15, 4  ;;  %s169_s18 = int_to_ptr.vmem [resolvable:$true] %s168_s18  ;;  %s167_s20 = int_to_ptr.hbm [resolvable:$true] %s166_s20 }
  0x1c   : > { %s155_s28 = scalar_lea.sflag [#allocation6], %s133_s25  ;;  %177 = sbr.rel (%p174_p3) target bundleno = 66 (0x42), region = 28 }
  0x1d   : > { %481 = dma.hbm_to_vmem [thread:$0]  (!%p476_p0), %s167_s20, 512, %s169_s18, %s155_s28  }
  0x1e   : > { %s793_s19 = sand.u32 (!%p174_p3), 1, %s683_s10  }
  0x1f   : > { %s796_s29 = sshll.u32 (!%p174_p3), %s793_s19, 5  ;;  %s180_s30 = scalar_lea.sflag (!%p174_p3), [#allocation3], %s793_s19 }
  0x20   : > { %s183_s3 = scalar_lea.vmem (!%p174_p3), [#allocation2], %s796_s29 }
  0x21   : > { %666 = dma.done.wait (%p763_p8), %s180_s30, 512  }
  0x22   : > { %668 = vsyncadd (%p763_p8), %s180_s30, 4294966784  ;;  %s190_s25 = scalar_lea.sflag [#allocation6], %s793_s19  ;;  %s806_s26 = scalar_lea.vmem [#allocation5], %s796_s29 }
  0x23   : > { %670 = dma.done.wait (%p763_p8), %s190_s25, 512  }
  0x24   : > { %672 = vsyncadd (%p763_p8), %s190_s25, 4294966784  ;;  %v288_v0 = vlaneseq  ;;  %s460_s27 = sshll.u32 %s691_s12, 3  ;;  %v230_v1 = vld [vmem:[%s183_s3] sm:$0xff]  ;;  %v231_v3 = vld [vmem:[%s183_s3 + $0x8] sm:$0xff]  ;;  %s468_s21 = sshll.u32 %s691_s12, 5 }
  0x25   : > { %v234_v4 = vmax.f32 %v230_v1, 0.001  ;;  %v290_v5 = vstv %s460_s27  ;;  %v235_v6 = vmax.f32 %v231_v3, 0.001  ;;  %v232_v7 = vld [vmem:[%s183_s3 + $0x10] sm:$0xff]  ;;  %v233_v8 = vld [vmem:[%s183_s3 + $0x18] sm:$0xff]  ;;  %s338_s6 = scalar_lea.hbm %s859_s2, %s468_s21 }
  0x26   : > { %v289_v2 = vshrl.u32 %v288_v0, 7  ;;  %v236_v12 = vmax.f32 %v232_v7, 0.001  ;;  %v237_v13 = vmax.f32 %v233_v8, 0.001  ;;  %v293_v16 = vand.u32 127, %v288_v0 }
  0x27   : > { %v238_v9 = vmin.f32 %v234_v4, 0.999  ;;  %v239_v10 = vmin.f32 %v235_v6, 0.999  ;;  %v242_v22 = vld [vmem:[%s806_s26] sm:$0xff]  ;;  %v243_v23 = vld [vmem:[%s806_s26 + $0x8] sm:$0xff] }
  0x28   : > { %v291_v11 = vadd.s32 %v290_v5, %v289_v2  ;;  %v240_v17 = vmin.f32 %v236_v12, 0.999  ;;  %v241_v18 = vmin.f32 %v237_v13, 0.999  ;;  %v294_v24 = vadd.s32 128, %v293_v16  ;;  %v244_v31 = vld [vmem:[%s806_s26 + $0x10] sm:$0xff] }
  0x29   : > { %537 = vlog2.f32 %v238_v9  ;;  %v266_v14 = vsub.f32 1.0, %v238_v9  ;;  %v267_v15 = vsub.f32 1.0, %v239_v10  ;;  %v295_v26 = vadd.s32 256, %v293_v16  ;;  %v245_v39 = vld [vmem:[%s806_s26 + $0x18] sm:$0xff]  ;;  %s219_s7 = scalar_lea.vmem [#allocation7], %s796_s29  ;;  %s342_s8 = sshll.u32 %s338_s6, 4  ;;  %s343_s8 = int_to_ptr.hbm [resolvable:$true] %s342_s8 }
  0x2a   : > { %539 = vlog2.f32 %v239_v10  ;;  %v297_v19 = vmul.u32 512, %v291_v11  ;;  %v268_v20 = vsub.f32 1.0, %v240_v17  ;;  %v269_v21 = vsub.f32 1.0, %v241_v18  ;;  %s340_s12 = sshll.u32 %s219_s7, 4  ;;  %s327_s15 = scalar_lea.sflag [#allocation4], %s793_s19  ;;  %s341_s12 = int_to_ptr.vmem [resolvable:$true] %s340_s12 }
  0x2b   : > { %541 = vlog2.f32 %v266_v14  ;;  %v262_v29 = vsub.f32 1.0, %v242_v22  ;;  %v263_v34 = vsub.f32 1.0, %v243_v23  ;;  %v296_v40 = vadd.s32 384, %v293_v16  ;;  %s627_s16 = sshra.s32 %s343_s8, 4  ;;  %s633_s29 = scalar_lea.hbm %s859_s2, 64  ;;  %s628_s16 = int_to_ptr.hbm [resolvable:$true] %s627_s16 }
  0x2c   : > { %543 = vlog2.f32 %v267_v15  ;;  %v298_v30 = vadd.s32 %v297_v19, %v293_v16  ;;  %v299_v38 = vadd.s32 %v297_v19, %v294_v24  ;;  %v264_v44 = vsub.f32 1.0, %v244_v31  ;;  %s629_s18 = scalar_lea.hbm %s628_s16, 32  ;;  %p634_p7 = scmp.lt.s32.totalorder %s628_s16, %s859_s2 }
  0x2d   : > { %545 = vlog2.f32 %v240_v17  ;;  %v300_v45 = vadd.s32 %v297_v19, %v295_v26  ;;  %v265_v54 = vsub.f32 1.0, %v245_v39  ;;  %v301_v62 = vadd.s32 %v297_v19, %v296_v40  ;;  %p630_p4 = scmp.ne.s32.totalorder %s628_s16, %s629_s18  ;;  %p635_p8 = scmp.lt.s32.totalorder %s633_s29, %s629_s18 }
  0x2e   : > { %547 = vlog2.f32 %v268_v20  ;;  %vm302_vm0 = vcmp.lt.s32.totalorder %v298_v30, 4096  ;;  %vm303_vm1 = vcmp.lt.s32.totalorder %v299_v38, 4096 }
  0x2f   : > { %v538_v25 = vpop.eup %537  ;;  %549 = vlog2.f32 %v241_v18  ;;  %vm304_vm2 = vcmp.lt.s32.totalorder %v300_v45, 4096  ;;  %vm305_vm3 = vcmp.lt.s32.totalorder %v301_v62, 4096  ;;  %p631_p5 = pnand %p630_p4, %p767_p9  ;;  %p636_p10 = por %p635_p8, %p634_p7 }
  0x30   : > { %v540_v27 = vpop.eup %539  ;;  %v247_v28 = vmul.f32 0.6931472, %v538_v25  ;;  %551 = vlog2.f32 %v269_v21 }
  0x31   : > { %v542_v32 = vpop.eup %541  ;;  %v249_v33 = vmul.f32 0.6931472, %v540_v27  ;;  %p632_p6 = pneg %p631_p5 }
  0x32   : > { %v544_v35 = vpop.eup %543  ;;  %v254_v36 = vmul.f32 %v247_v28, %v242_v22  ;;  %v271_v37 = vmul.f32 0.6931472, %v542_v32 }
  0x33   : > { %v546_v41 = vpop.eup %545  ;;  %v255_v42 = vmul.f32 %v249_v33, %v243_v23  ;;  %v273_v43 = vmul.f32 0.6931472, %v544_v35  ;;  %p637_p13 = pnand %p636_p10, %p632_p6 }
  0x34   : > { %v548_v46 = vpop.eup %547  ;;  %v258_v47 = vsub.f32 0.0, %v254_v36  ;;  %v278_v48 = vmul.f32 %v271_v37, %v262_v29  ;;  %v251_v49 = vmul.f32 0.6931472, %v546_v41 }
  0x35   : > { %v550_v50 = vpop.eup %549  ;;  %v259_v51 = vsub.f32 0.0, %v255_v42  ;;  %v279_v52 = vmul.f32 %v273_v43, %v263_v34  ;;  %v275_v53 = vmul.f32 0.6931472, %v548_v46 }
  0x36   : > { %v552_v55 = vpop.eup %551  ;;  %v282_v56 = vsub.f32 %v258_v47, %v278_v48  ;;  %v256_v57 = vmul.f32 %v251_v49, %v244_v31  ;;  %v253_v58 = vmul.f32 0.6931472, %v550_v50 }
  0x37   : > { %v283_v59 = vsub.f32 %v259_v51, %v279_v52  ;;  %v280_v60 = vmul.f32 %v275_v53, %v264_v44  ;;  %v277_v61 = vmul.f32 0.6931472, %v552_v55 }
  0x38   : > { %v306_v63 = vsel %vm302_vm0, %v282_v56, 0.0  ;;  %v260_v0 = vsub.f32 0.0, %v256_v57  ;;  %v257_v1 = vmul.f32 %v253_v58, %v245_v39 }
  0x39   : > { %v307_v2 = vsel %vm303_vm1, %v283_v59, 0.0  ;;  %v281_v3 = vmul.f32 %v277_v61, %v265_v54  ;;  %322 = vst [vmem:[%s219_s7] sm:$0xff] %v306_v63 }
  0x3a   : > { %v284_v4 = vsub.f32 %v260_v0, %v280_v60  ;;  %v261_v5 = vsub.f32 0.0, %v257_v1  ;;  %323 = vst [vmem:[%s219_s7 + $0x8] sm:$0xff] %v307_v2 }
  0x3c   : > { %v308_v6 = vsel %vm304_vm2, %v284_v4, 0.0  ;;  %v285_v7 = vsub.f32 %v261_v5, %v281_v3 }
  0x3d   : > { %324 = vst [vmem:[%s219_s7 + $0x10] sm:$0xff] %v308_v6 }
  0x3e   : > { %v309_v8 = vsel %vm305_vm3, %v285_v7, 0.0 }
  0x3f   : > { %325 = vst [vmem:[%s219_s7 + $0x18] sm:$0xff] %v309_v8 }
  0x40   : > { %640 = shalt.err (!%p637_p13)
}
  0x41   : > { %473 = dma.vmem_to_hbm [thread:$0]  (%p767_p9), %s341_s12, 512, %s343_s8, %s327_s15  }
  0x42 PF: > { %s354_s19 = sand.u32 1, %s679_s9   ;;  %p483_p0 = pnand %p449_p12, %p774_p11 }
  0x43   : > { %s355_s25 = scalar_lea.sflag [#allocation4], %s354_s19 }
  0x44   : > { %p484_p1 = pneg %p483_p0 }
  0x46   : > { %674 = dma.done.wait (%p484_p1), %s355_s25, 512  }
  0x47   : > { %676 = vsyncadd (%p484_p1), %s355_s25, 4294966784  ;;  %s21_s14 = sadd.s32 1, %s699_s14   ;;  %s864_s9 = smov %s683_s10 }
  0x48   : > { %p18_p2 = scmp.ge.s32.totalorder %s21_s14, 4   ;;  %s865_s10 = smov %s687_s11 }
  0x49   : > { %s866_s11 = smov %s772_s23  ;;  %s867_s12 = smov %s695_s13 }
  0x4a   : > { %s868_s13 = smov %s870_s17  ;;  %20 = sbr.rel (!%p18_p2) target bundleno = 8 (0x8), region = 90 }
  0x4f   :  { %361 = vsyncpa [#allocation3], 1 }
  0x50   :  { %363 = vsyncpa [#allocation3 + $0x1], 1 }
  0x51   :  { %364 = vsyncpa [#allocation6], 1 }
  0x52   :  { %366 = vsyncpa [#allocation6 + $0x1], 1 }
  0x53   :  { %367 = vsyncpa [#allocation4], 1 }
  0x54   :  { %369 = vsyncpa [#allocation4 + $0x1], 1 }

</bundles_post_ra>
